<compile_context>
chip_gen: v5e
topology: v5e:2x2
jax: 0.10.0
libtpu: 0.0.40
codegen_flags: <defaults>
</compile_context>

<pallas_src>
import functools

import jax
import jax.numpy as jnp
from jax.experimental import pallas as pl
from jax.experimental.pallas import tpu as pltpu

_LO = -3.0
_HI = 3.0
_LANE = 128


def _clip_kernel(x_ref, o_ref):
    # Pure VPU elementwise: max(min(x, 3), -3)
    o_ref[...] = jnp.clip(x_ref[...], _LO, _HI)


def _round_up(a, b):
    return ((a + b - 1) // b) * b


def _min_sublane(dtype):
    # Min second-to-last tile dim per dtype packing: 8 (32-bit), 16 (16-bit),
    # 32 (8-bit).
    itemsize = jnp.dtype(dtype).itemsize
    return max(8, 32 // itemsize)


def _clip_slab(slab, row_tile, grid_n):
    rows, lane = slab.shape
    itemsize = jnp.dtype(slab.dtype).itemsize
    return pl.pallas_call(
        _clip_kernel,
        out_shape=jax.ShapeDtypeStruct((rows, lane), slab.dtype),
        grid_spec=pltpu.PrefetchScalarGridSpec(
            num_scalar_prefetch=0,
            grid=(grid_n,),
            in_specs=[pl.BlockSpec((row_tile, lane), lambda i: (i, 0))],
            out_specs=pl.BlockSpec((row_tile, lane), lambda i: (i, 0)),
        ),
        compiler_params=pltpu.CompilerParams(
            dimension_semantics=("parallel",),
            vmem_limit_bytes=32 << 20,
        ),
        cost_estimate=pl.CostEstimate(
            flops=2 * rows * lane,              # min + max per element
            transcendentals=0,
            bytes_accessed=2 * rows * lane * itemsize,
        ),
    )(slab)


@functools.partial(jax.jit, static_argnames=("max_row_tile",))
def clip_pallas(x, max_row_tile=8192):
    """Clip an arbitrary-shape tensor to [-3, 3] with a Pallas TPU kernel."""
    orig_shape = x.shape
    n = x.size
    flat = x.reshape(-1)

    sub = _min_sublane(x.dtype)
    rows = n // _LANE                 # full lanes only (aligned prefix)
    n_main = rows * _LANE

    if rows == 0:
        # Fewer than 128 elements: a kernel launch isn't worth it.
        return jnp.clip(flat, _LO, _HI).reshape(orig_shape)

    # ---- tiling (static Python ints at trace time) ----
    if rows < 2 * sub:
        # Single block equal to the full array dims (always a legal block).
        grid_n = 1
        row_tile = rows
    else:
        # >= 2 grid steps so both v7x TensorCores get work; balance rows across
        # steps, rounded to the dtype's sublane multiple.  The last block may
        # be ragged; Pallas masks the out-of-bounds rows.
        grid_n = max(2, pl.cdiv(rows, max_row_tile))
        row_tile = _round_up(pl.cdiv(rows, grid_n), sub)
        grid_n = pl.cdiv(rows, row_tile)

    if n_main == n:
        # Fast path: pure reshape (bitcast), no pad, no slice, no alias copy.
        slab = flat.reshape(rows, _LANE)
        out = _clip_slab(slab, row_tile, grid_n)
        return out.reshape(orig_shape)

    # Unaligned fallback: kernel on the 128-aligned prefix, tiny (<128 elem)
    # tail handled with a plain clip.  No full-tensor padding round trip.
    slab = flat[:n_main].reshape(rows, _LANE)
    out_main = _clip_slab(slab, row_tile, grid_n).reshape(-1)
    tail = jnp.clip(flat[n_main:], _LO, _HI)
    return jnp.concatenate([out_main, tail]).reshape(orig_shape)


if __name__ == "__main__":
    key = jax.random.PRNGKey(0)
    # R4 f32 input consistent with the module (Clip_F32_R4): NCHW
    x = jax.random.normal(key, (2, 4, 16, 16), dtype=jnp.float32) * 5.0

    y = clip_pallas(x)
    y = jax.block_until_ready(y)

    # Correctness check against the reference semantics of torch.clip
    y_ref = jnp.clip(x, -3.0, 3.0)
    assert y.shape == x.shape and y.dtype == x.dtype
    assert jnp.allclose(y, y_ref), "mismatch vs reference clip"

    print("KERNEL_OK")
</pallas_src>

<mosaic_0001>
module attributes {stable_mosaic.version = 11 : i64} {
  func.func @_clip_kernel(%arg0: i32, %arg1: memref<8x128xf32, #tpu.memory_space<vmem>>, %arg2: memref<8x128xf32, #tpu.memory_space<vmem>>) attributes {dimension_semantics = [#tpu.dimension_semantics<parallel>], iteration_bounds = array<i64: 2>, scalar_prefetch = 0 : i64, scratch_operands = 0 : i64, tpu.core_type = #tpu.core_type<tc>, window_params = [{transform_indices = @transform_0, window_bounds = array<i64: 8, 128>}, {transform_indices = @transform_1, window_bounds = array<i64: 8, 128>}]} {
    %c0 = arith.constant 0 : index
    %c0_0 = arith.constant 0 : index
    %0 = vector.load %arg1[%c0, %c0_0] : memref<8x128xf32, #tpu.memory_space<vmem>>, vector<8x128xf32>
    %cst = arith.constant -3.000000e+00 : f32
    %cst_1 = arith.constant 3.000000e+00 : f32
    %1 = vector.broadcast %cst : f32 to vector<8x128xf32>
    %2 = arith.maximumf %1, %0 : vector<8x128xf32>
    %3 = vector.broadcast %cst_1 : f32 to vector<8x128xf32>
    %4 = arith.minimumf %3, %2 : vector<8x128xf32>
    %c0_2 = arith.constant 0 : index
    %c0_3 = arith.constant 0 : index
    %5 = vector.load %arg2[%c0_2, %c0_3] : memref<8x128xf32, #tpu.memory_space<vmem>>, vector<8x128xf32>
    tpu.vector_store %arg2[%c0_2, %c0_3], %4 {strides = array<i32>} : memref<8x128xf32, #tpu.memory_space<vmem>>, vector<8x128xf32>,
    return
  }
  func.func @transform_0(%arg0: i32) -> (i32, i32) {
    %c0_i32 = arith.constant 0 : i32
    %c0_i32_0 = arith.constant 0 : i32
    return %arg0, %c0_i32 : i32, i32
  }
  func.func @transform_1(%arg0: i32) -> (i32, i32) {
    %c0_i32 = arith.constant 0 : i32
    %c0_i32_0 = arith.constant 0 : i32
    return %arg0, %c0_i32 : i32, i32
  }
}

</mosaic_0001>

<bundles_post_ra>
// kernel: clip_pallas.1
= control target key start
LH: loop header
LB: loop body
LE: loop exit
PB: predicated region body
PF: predicated region fallthrough
CT: control target
= control target key end

     0   :  { %s191_s6 = smov 0   ;;  %s211_s0 = inlined_call_operand.vmem [shape: f32[16,128], index: 0, kind: input, shape index: {}]   ;;  %s212_s1 = inlined_call_operand.vmem [shape: f32[16,128], index: 1, kind: output, shape index: {}]  }
   0x1 LB: > { %s169_s7 = sadd.s32 4294967295, %s193_s6   ;;  %p173_p0 = scmp.ge.s32.totalorder %s193_s6, 1  ;;  %s193_s6 = sphi %s191_s6, %s11_s6  }
   0x2   : > { %p86_p1 = scmp.lt.s32.totalorder %s193_s6, 3 }
   0x4   : > { %p87_p2 = pnand %p173_p0, %p86_p1 }
   0x5   : > { %p104_p3 = scmp.lt.s32.totalorder (!%p87_p2), %s169_s7, 1 }
   0x6   : > { %90 = sbr.rel (%p87_p2) target bundleno = 18 (0x12), region = 24 }
   0xb   : > { %s214_s7 = smov (!%p104_p3, %s169_s7), 1 }
   0xc   : > { %s174_s8 = sshll.u32 %s214_s7, 3 }
   0xd   : > { %s107_s11 = scalar_lea.vmem %s211_s0, %s174_s8  ;;  %s111_s14 = scalar_lea.vmem %s212_s1, %s174_s8 }
   0xe   : > { %v112_v0 = vld [vmem:[%s107_s11] sm:$0xff] }
   0xf   : > { %v176_v1 = vclamps-f32 %v112_v0, 3.0 }
  0x11   : > { %115 = vst [vmem:[%s111_s14] sm:$0xff] %v176_v1 }
  0x12 PF: > { %s11_s6 = sadd.s32 1, %s193_s6  }
  0x13   : > { %p8_p4 = scmp.ge.s32.totalorder %s11_s6, 4  }
  0x15   :  { %10 = sbr.rel (!%p8_p4) target bundleno = 1 (0x1), region = 54 }

</bundles_post_ra>
